<compile_context>
chip_gen: v5e
topology: v5e:2x2
jax: 0.10.0
libtpu: 0.0.40
codegen_flags: <defaults>
</compile_context>

<pallas_src>
import functools
import math

import jax
import jax.numpy as jnp
from jax.experimental import pallas as pl
from jax.experimental.pallas import tpu as pltpu


def _round_up(x, m):
    return (x + m - 1) // m * m


def _vmem_capacity_bytes():
    try:
        return int(pltpu.get_tpu_info().vmem_capacity_bytes)
    except Exception:
        # Conservative fallback (v7x per-TensorCore VMEM).
        return 64 * 1024 * 1024


_VMEM_CAP = _vmem_capacity_bytes()
_VMEM_HEADROOM = 4 * 1024 * 1024


def _gelu(h, approx):
    if approx:
        # tanh GELU lowers to the EUP slot (near-free when VALU is the
        # bottleneck, e.g. v5e small-D configs).
        return jax.nn.gelu(h, approximate=True)
    # Exact erf GELU == torch.nn.GELU() default.
    return 0.5 * h * (1.0 + jax.lax.erf(h * (1.0 / math.sqrt(2.0))))


def _pick_chunk(hp, ceiling):
    # Largest 128-multiple divisor of hp that is <= ceiling (hp is always a
    # multiple of 128 after padding, so 128 always succeeds).
    for c in (1024, 512, 384, 256, 128):
        if c <= ceiling and hp % c == 0:
            return c
    return hp


# --------------------- resident-weight fast path ---------------------------
def _mlp_resident_kernel(x_ref, w1_ref, b1_ref, w2_ref, b2_ref, o_ref,
                         acc_ref, *, h_chunk, n_chunks, approx_gelu):
    x = x_ref[...]                                    # (tm, Dp) bf16
    for c in range(n_chunks):                         # static, unrolled
        lo = c * h_chunk
        # fc1 chunk: (tm, Dp) @ (Dp, hc) -> f32 on MXU
        h = jnp.dot(x, w1_ref[:, lo:lo + h_chunk],
                    preferred_element_type=jnp.float32)
        h = _gelu(h + b1_ref[:, lo:lo + h_chunk], approx_gelu)
        # TODO(synk): dropout is identity here (inference semantics); a
        # training-mode dropout would need pltpu.prng_seed/prng_random_bits.
        upd = jnp.dot(h.astype(w2_ref.dtype), w2_ref[lo:lo + h_chunk, :],
                      preferred_element_type=jnp.float32)
        if c == 0:
            acc_ref[...] = upd                        # stable f32 VMEM buffer
        else:
            acc_ref[...] += upd
    o_ref[...] = (acc_ref[...] + b2_ref[...]).astype(o_ref.dtype)


# --------------------- streamed-weight fallback -----------------------------
def _mlp_stream_kernel(x_ref, w1_ref, b1_ref, w2_ref, b2_ref, o_ref,
                       acc_ref, *, approx_gelu):
    hb = pl.program_id(1)

    h = jnp.dot(x_ref[...], w1_ref[...], preferred_element_type=jnp.float32)
    h = _gelu(h + b1_ref[...], approx_gelu)
    upd = jnp.dot(h.astype(w2_ref.dtype), w2_ref[...],
                  preferred_element_type=jnp.float32)

    @pl.when(hb == 0)
    def _():
        acc_ref[...] = upd

    @pl.when(hb != 0)
    def _():
        acc_ref[...] += upd

    @pl.when(hb == pl.num_programs(1) - 1)
    def _():
        o_ref[...] = (acc_ref[...] + b2_ref[...]).astype(o_ref.dtype)


# --------------------- host-side wrappers -----------------------------------
def prepare_mlp_params(w1, b1, w2, b2, compute_dtype=jnp.bfloat16):
    """Cast + zero-pad weights/biases once (hoisted out of the per-call path).

    w1: [D, 4D], b1: [4D], w2: [4D, D], b2: [D].
    """
    D, H = w1.shape
    Dp = _round_up(D, 128)
    Hp = _round_up(H, 128)
    w1p = jnp.pad(w1.astype(compute_dtype), ((0, Dp - D), (0, Hp - H)))
    w2p = jnp.pad(w2.astype(compute_dtype), ((0, Hp - H), (0, Dp - D)))
    b1p = jnp.pad(b1.astype(jnp.float32), (0, Hp - H)).reshape(1, Hp)
    b2p = jnp.pad(b2.astype(jnp.float32), (0, Dp - D)).reshape(1, Dp)
    return w1p, b1p, w2p, b2p


@functools.partial(
    jax.jit,
    static_argnames=("tm", "approx_gelu", "out_dtype", "force_stream"))
def mlp_forward(x, w1p, b1p, w2p, b2p, *, tm=None, approx_gelu=False,
                out_dtype=None, force_stream=False):
    """x: [B, S, D]; w1p/b1p/w2p/b2p from prepare_mlp_params."""
    B, S, D = x.shape
    M = B * S
    Dp, Hp = w1p.shape
    compute_dtype = w1p.dtype
    itemsize = jnp.dtype(compute_dtype).itemsize
    if out_dtype is None:
        out_dtype = x.dtype
    out_itemsize = jnp.dtype(out_dtype).itemsize

    # ---- M tiling: big tiles, but keep >= 2 grid steps for small M so both
    # v7x TensorCores get work and the pipeline has something to overlap. ----
    if tm is None:
        tm = 256
        while tm > 8 and _round_up(M, tm) // tm < 2:
            tm //= 2
    tm = max(8, _round_up(tm, 8))
    Mp = _round_up(M, tm)
    m_steps = Mp // tm

    # Wrapper-side layout plumbing for the activation only (weights were
    # prepared once). Zero pads keep the math exact in the valid region.
    x2 = jnp.pad(x.reshape(M, D).astype(compute_dtype),
                 ((0, Mp - M), (0, Dp - D)))

    vmem_budget = max(_VMEM_CAP - _VMEM_HEADROOM, 16 * 1024 * 1024)
    weight_bytes = 2 * Dp * Hp * itemsize
    bias_bytes = (Hp + Dp) * 4

    def tile_bytes(hc):
        return (2 * tm * Dp * itemsize        # x tile, double-buffered
                + 2 * tm * Dp * out_itemsize  # out tile, double-buffered
                + tm * Dp * 4                 # f32 scratch accumulator
                + 2 * tm * hc * 4)            # f32 GELU intermediate slack

    # Resident-weight plan: prefer 1024-wide H chunks, drop to <=512 if tight.
    hc_res = _pick_chunk(Hp, 1024)
    needed_res = weight_bytes + bias_bytes + tile_bytes(hc_res)
    if needed_res > int(0.75 * vmem_budget) and hc_res > 512:
        hc_res = _pick_chunk(Hp, 512)
        needed_res = weight_bytes + bias_bytes + tile_bytes(hc_res)
    use_resident = (needed_res <= int(0.75 * vmem_budget)) and not force_stream

    if use_resident:
        n_chunks = Hp // hc_res
        needed = needed_res
        kernel = functools.partial(_mlp_resident_kernel, h_chunk=hc_res,
                                   n_chunks=n_chunks, approx_gelu=approx_gelu)
        grid_spec = pltpu.PrefetchScalarGridSpec(
            num_scalar_prefetch=0,
            grid=(m_steps,),
            in_specs=[
                pl.BlockSpec((tm, Dp), lambda i: (i, 0)),            # x tile
                pl.BlockSpec(memory_space=pltpu.MemorySpace.VMEM),   # w1
                pl.BlockSpec(memory_space=pltpu.MemorySpace.VMEM),   # b1
                pl.BlockSpec(memory_space=pltpu.MemorySpace.VMEM),   # w2
                pl.BlockSpec(memory_space=pltpu.MemorySpace.VMEM),   # b2
            ],
            out_specs=pl.BlockSpec((tm, Dp), lambda i: (i, 0)),
            scratch_shapes=[pltpu.VMEM((tm, Dp), jnp.float32)],
        )
        dims = ("parallel",)
        weight_traffic = weight_bytes
    else:
        # Stream w1/w2 over an H grid axis; BlockSpec double-buffers the
        # weight tiles and overlaps their DMA with MXU work.
        th = _pick_chunk(Hp, 512)
        needed = (4 * Dp * th * itemsize       # w1/w2 tiles, double-buffered
                  + 2 * th * 4 + Dp * 4        # b1 tile (dbuf) + b2 resident
                  + tile_bytes(th))
        kernel = functools.partial(_mlp_stream_kernel, approx_gelu=approx_gelu)
        grid_spec = pltpu.PrefetchScalarGridSpec(
            num_scalar_prefetch=0,
            grid=(m_steps, Hp // th),
            in_specs=[
                pl.BlockSpec((tm, Dp), lambda i, h: (i, 0)),          # x tile
                pl.BlockSpec((Dp, th), lambda i, h: (0, h)),          # w1 tile
                pl.BlockSpec((1, th), lambda i, h: (0, h)),           # b1 tile
                pl.BlockSpec((th, Dp), lambda i, h: (h, 0)),          # w2 tile
                pl.BlockSpec(memory_space=pltpu.MemorySpace.VMEM),    # b2
            ],
            out_specs=pl.BlockSpec((tm, Dp), lambda i, h: (i, 0)),
            scratch_shapes=[pltpu.VMEM((tm, Dp), jnp.float32)],
        )
        dims = ("parallel", "arbitrary")
        weight_traffic = m_steps * weight_bytes

    vmem_limit = int(min(max(needed * 1.25 + (2 << 20), 32 * 1024 * 1024),
                         vmem_budget))

    cost = pl.CostEstimate(
        flops=4 * Mp * Dp * Hp,                       # two matmuls: 2*M*K*N each
        transcendentals=(Mp * Hp) if approx_gelu else 0,
        bytes_accessed=(Mp * Dp * itemsize + weight_traffic + bias_bytes
                        + Mp * Dp * out_itemsize),
    )

    out = pl.pallas_call(
        kernel,
        out_shape=jax.ShapeDtypeStruct((Mp, Dp), out_dtype),
        grid_spec=grid_spec,
        compiler_params=pltpu.CompilerParams(
            dimension_semantics=dims,
            vmem_limit_bytes=vmem_limit,
        ),
        cost_estimate=cost,
    )(x2, w1p, b1p, w2p, b2p)

    return out[:M, :D].reshape(B, S, D)


def _reference_mlp(x, w1, b1, w2, b2):
    h = x @ w1 + b1
    h = 0.5 * h * (1.0 + jax.lax.erf(h / math.sqrt(2.0)))
    return h @ w2 + b2


if __name__ == "__main__":
    # Small config consistent with the module: d_model=32 -> hidden=128.
    B, S, D = 2, 8, 32
    H = 4 * D

    key = jax.random.PRNGKey(0)
    kx, k1, k2, k3, k4 = jax.random.split(key, 5)

    x = jax.random.normal(kx, (B, S, D), dtype=jnp.float32)
    # Deterministic init mimicking nn.Linear's uniform(-1/sqrt(fan_in), ...).
    bound1 = 1.0 / math.sqrt(D)
    bound2 = 1.0 / math.sqrt(H)
    w1 = jax.random.uniform(k1, (D, H), jnp.float32, -bound1, bound1)
    b1 = jax.random.uniform(k2, (H,), jnp.float32, -bound1, bound1)
    w2 = jax.random.uniform(k3, (H, D), jnp.float32, -bound2, bound2)
    b2 = jax.random.uniform(k4, (D,), jnp.float32, -bound2, bound2)

    # Weight cast+pad hoisted out of the per-call path.
    params = prepare_mlp_params(w1, b1, w2, b2)
    params = jax.block_until_ready(params)

    ref = _reference_mlp(x.reshape(-1, D), w1, b1, w2, b2).reshape(B, S, D)

    # Resident-weight fast path.
    out = mlp_forward(x, *params)
    jax.block_until_ready(out)
    assert out.shape == (B, S, D)
    err = float(jnp.max(jnp.abs(out - ref)))
    assert jnp.allclose(out, ref, atol=2e-2, rtol=2e-2), err

    # Streamed-weight fallback path (same semantics, big-D / v7x shapes).
    out_s = mlp_forward(x, *params, force_stream=True)
    jax.block_until_ready(out_s)
    err_s = float(jnp.max(jnp.abs(out_s - ref)))
    assert jnp.allclose(out_s, ref, atol=2e-2, rtol=2e-2), err_s

    print("KERNEL_OK")
</pallas_src>

<mosaic_0001>
module attributes {stable_mosaic.version = 11 : i64} {
  func.func @_mlp_resident_kernel(%arg0: i32, %arg1: memref<8x128xbf16, #tpu.memory_space<vmem>>, %arg2: memref<128x128xbf16, #tpu.memory_space<vmem>>, %arg3: memref<1x128xf32, #tpu.memory_space<vmem>>, %arg4: memref<128x128xbf16, #tpu.memory_space<vmem>>, %arg5: memref<1x128xf32, #tpu.memory_space<vmem>>, %arg6: memref<8x128xf32, #tpu.memory_space<vmem>>, %arg7: memref<8x128xf32, #tpu.memory_space<vmem>>) attributes {dimension_semantics = [#tpu.dimension_semantics<parallel>], iteration_bounds = array<i64: 2>, scalar_prefetch = 0 : i64, scratch_operands = 1 : i64, tpu.core_type = #tpu.core_type<tc>, window_params = [{transform_indices = @transform_0, window_bounds = array<i64: 8, 128>}, {pipeline_mode = #tpu.pipeline_mode<synchronous>, transform_indices = @transform_1, window_bounds = array<i64: 128, 128>}, {pipeline_mode = #tpu.pipeline_mode<synchronous>, transform_indices = @transform_2, window_bounds = array<i64: 1, 128>}, {pipeline_mode = #tpu.pipeline_mode<synchronous>, transform_indices = @transform_3, window_bounds = array<i64: 128, 128>}, {pipeline_mode = #tpu.pipeline_mode<synchronous>, transform_indices = @transform_4, window_bounds = array<i64: 1, 128>}, {transform_indices = @transform_5, window_bounds = array<i64: 8, 128>}]} {
    %c0 = arith.constant 0 : index
    %c0_0 = arith.constant 0 : index
    %0 = vector.load %arg1[%c0, %c0_0] : memref<8x128xbf16, #tpu.memory_space<vmem>>, vector<8x128xbf16>
    %c0_1 = arith.constant 0 : index
    %c0_2 = arith.constant 0 : index
    %1 = vector.load %arg2[%c0_1, %c0_2] : memref<128x128xbf16, #tpu.memory_space<vmem>>, vector<128x128xbf16>
    %cst = arith.constant dense<0.000000e+00> : vector<8x128xf32>
    %2 = tpu.matmul %0, %1, %cst {dimension_numbers = #tpu.dot_dimension_numbers<[1], [0], [0], [1], [0, 0, 1, 1], [], []>} : vector<8x128xbf16>, vector<128x128xbf16>, vector<8x128xf32> -> vector<8x128xf32>
    %c0_3 = arith.constant 0 : index
    %c0_4 = arith.constant 0 : index
    %3 = vector.load %arg3[%c0_3, %c0_4] : memref<1x128xf32, #tpu.memory_space<vmem>>, vector<1x128xf32>
    %4 = vector.broadcast %3 : vector<1x128xf32> to vector<8x128xf32>
    %5 = arith.addf %2, %4 : vector<8x128xf32>
    %cst_5 = arith.constant 5.000000e-01 : f32
    %6 = vector.broadcast %cst_5 : f32 to vector<8x128xf32>
    %7 = arith.mulf %6, %5 : vector<8x128xf32>
    %cst_6 = arith.constant 0.707106769 : f32
    %8 = vector.broadcast %cst_6 : f32 to vector<8x128xf32>
    %9 = arith.mulf %5, %8 : vector<8x128xf32>
    %10 = math.erf %9 : vector<8x128xf32>
    %cst_7 = arith.constant 1.000000e+00 : f32
    %11 = vector.broadcast %cst_7 : f32 to vector<8x128xf32>
    %12 = arith.addf %11, %10 : vector<8x128xf32>
    %13 = arith.mulf %7, %12 : vector<8x128xf32>
    %14 = arith.truncf %13 : vector<8x128xf32> to vector<8x128xbf16>
    %c0_8 = arith.constant 0 : index
    %c0_9 = arith.constant 0 : index
    %15 = vector.load %arg4[%c0_8, %c0_9] : memref<128x128xbf16, #tpu.memory_space<vmem>>, vector<128x128xbf16>
    %cst_10 = arith.constant dense<0.000000e+00> : vector<8x128xf32>
    %16 = tpu.matmul %14, %15, %cst_10 {dimension_numbers = #tpu.dot_dimension_numbers<[1], [0], [0], [1], [0, 0, 1, 1], [], []>} : vector<8x128xbf16>, vector<128x128xbf16>, vector<8x128xf32> -> vector<8x128xf32>
    %c0_11 = arith.constant 0 : index
    %c0_12 = arith.constant 0 : index
    %17 = vector.load %arg7[%c0_11, %c0_12] : memref<8x128xf32, #tpu.memory_space<vmem>>, vector<8x128xf32>
    tpu.vector_store %arg7[%c0_11, %c0_12], %16 {strides = array<i32>} : memref<8x128xf32, #tpu.memory_space<vmem>>, vector<8x128xf32>,
    %c0_13 = arith.constant 0 : index
    %c0_14 = arith.constant 0 : index
    %18 = vector.load %arg7[%c0_13, %c0_14] : memref<8x128xf32, #tpu.memory_space<vmem>>, vector<8x128xf32>
    %c0_15 = arith.constant 0 : index
    %c0_16 = arith.constant 0 : index
    %19 = vector.load %arg5[%c0_15, %c0_16] : memref<1x128xf32, #tpu.memory_space<vmem>>, vector<1x128xf32>
    %20 = vector.broadcast %19 : vector<1x128xf32> to vector<8x128xf32>
    %21 = arith.addf %18, %20 : vector<8x128xf32>
    %c0_17 = arith.constant 0 : index
    %c0_18 = arith.constant 0 : index
    %22 = vector.load %arg6[%c0_17, %c0_18] : memref<8x128xf32, #tpu.memory_space<vmem>>, vector<8x128xf32>
    tpu.vector_store %arg6[%c0_17, %c0_18], %21 {strides = array<i32>} : memref<8x128xf32, #tpu.memory_space<vmem>>, vector<8x128xf32>,
    return
  }
  func.func @transform_0(%arg0: i32) -> (i32, i32) {
    %c0_i32 = arith.constant 0 : i32
    %c0_i32_0 = arith.constant 0 : i32
    return %arg0, %c0_i32 : i32, i32
  }
  func.func @transform_1(%arg0: i32) -> (i32, i32) {
    %c0_i32 = arith.constant 0 : i32
    %c0_i32_0 = arith.constant 0 : i32
    %c0_i32_1 = arith.constant 0 : i32
    return %c0_i32, %c0_i32_0 : i32, i32
  }
  func.func @transform_2(%arg0: i32) -> (i32, i32) {
    %c0_i32 = arith.constant 0 : i32
    %c0_i32_0 = arith.constant 0 : i32
    %c0_i32_1 = arith.constant 0 : i32
    return %c0_i32, %c0_i32_0 : i32, i32
  }
  func.func @transform_3(%arg0: i32) -> (i32, i32) {
    %c0_i32 = arith.constant 0 : i32
    %c0_i32_0 = arith.constant 0 : i32
    %c0_i32_1 = arith.constant 0 : i32
    return %c0_i32, %c0_i32_0 : i32, i32
  }
  func.func @transform_4(%arg0: i32) -> (i32, i32) {
    %c0_i32 = arith.constant 0 : i32
    %c0_i32_0 = arith.constant 0 : i32
    %c0_i32_1 = arith.constant 0 : i32
    return %c0_i32, %c0_i32_0 : i32, i32
  }
  func.func @transform_5(%arg0: i32) -> (i32, i32) {
    %c0_i32 = arith.constant 0 : i32
    %c0_i32_0 = arith.constant 0 : i32
    return %arg0, %c0_i32 : i32, i32
  }
}

</mosaic_0001>

<bundles_post_ra>
// kernel: mlp_forward.1
= control target key start
LH: loop header
LB: loop body
LE: loop exit
PB: predicated region body
PF: predicated region fallthrough
CT: control target
= control target key end

     0   :  { %10 = vsyncpa [#allocation4], 0  ;;  %s836_s0 = inlined_call_operand.vmem [shape: bf16[16,128], index: 0, kind: input, shape index: {}]   ;;  %s837_s1 = inlined_call_operand.hbm [shape: bf16[128,128], index: 1, kind: input, shape index: {}]   ;;  %s838_s2 = inlined_call_operand.vmem [shape: f32[1,128], index: 2, kind: input, shape index: {}]   ;;  %s839_s3 = inlined_call_operand.hbm [shape: bf16[128,128], index: 3, kind: input, shape index: {}]   ;;  %s840_s4 = inlined_call_operand.vmem [shape: f32[1,128], index: 4, kind: input, shape index: {}]   ;;  %s841_s5 = inlined_call_operand.vmem [shape: f32[16,128], index: 5, kind: output, shape index: {}]  }
   0x1   :  { %11 = vsyncpa [#allocation6], 0  ;;  %s780_s18 = smov 0  }
   0x2 LB: > { %s169_s21 = sshll.u32 %s837_s1, 4  ;;  %s789_s22 = sadd.s32 4294967295, %s744_s18   ;;  %s744_s18 = sphi %s780_s18, %s17_s18   ;;  %s170_s21 = int_to_ptr.hbm [resolvable:$true] %s169_s21 }
   0x3   : > { %p543_p0 = scmp.ge.s32.totalorder %s744_s18, 1  ;;  %p158_p1 = scmp.lt.s32.totalorder %s744_s18, 3 }
   0x4   : > { %p650_p2 = scmp.eq.s32.totalorder %s789_s22, 0  ;;  %s746_s24 = smov [#allocation3]  }
   0x5   : > { %p794_p3 = pnand %p543_p0, %p158_p1  ;;  %s171_s25 = sshll.u32 %s746_s24, 4  ;;  %s172_s25 = int_to_ptr.vmem [resolvable:$true] %s171_s25 }
   0x6   : > { %s186_s28 = sshll.u32 %s839_s3, 4  ;;  %s747_s29 = smov [#allocation5]   ;;  %s187_s28 = int_to_ptr.hbm [resolvable:$true] %s186_s28 }
   0x7   : > { %p643_p4 = pneg %p794_p3  ;;  %s188_s30 = sshll.u32 %s747_s29, 4  ;;  %s189_s30 = int_to_ptr.vmem [resolvable:$true] %s188_s30 }
   0x8   : > { %s748_s6 = smov 64   ;;  %s749_s7 = smov 4  }
   0x9   : > { %p644_p5 = pnand %p650_p2, %p643_p4  ;;  %214 = sbr.rel (%p794_p3) target bundleno = 364 (0x16c), region = 40 }
   0xb   : > { %646 = dma.hbm_to_vmem [thread:$0]  (!%p644_p5), %s170_s21, 1024, %s172_s25, [#allocation4], %s748_s6, %s748_s6, %s749_s7  }
   0xc   : > { %649 = dma.hbm_to_vmem [thread:$0]  (!%p644_p5), %s187_s28, 1024, %s189_s30, [#allocation6], %s748_s6, %s748_s6, %s749_s7  }
   0xe   : > { %735 = dma.done.wait (%p650_p2), [#allocation4], 1024  }
   0xf   : > { %737 = vsyncadd (%p650_p2), [#allocation4], 4294966272 }
  0x10   : > { %739 = dma.done.wait (%p650_p2), [#allocation6], 1024  }
  0x11   : > { %741 = vsyncadd (%p650_p2), [#allocation6], 4294966272  ;;  %v626_v0 = vld [vmem:[#allocation3 + $0x38] sm:$0xff]  ;;  %v625_v1 = vld [vmem:[#allocation3 + $0x30] sm:$0xff]  ;;  %p246_p6 = scmp.lt.s32.totalorder %s789_s22, 1 }
  0x12   : > { %323 = vmatpush.bf16.msra.mxu0 %v626_v0  ;;  %v624_v2 = vld [vmem:[#allocation3 + $0x28] sm:$0xff]  ;;  %v623_v3 = vld [vmem:[#allocation3 + $0x20] sm:$0xff]  ;;  %v622_v4 = vld [vmem:[#allocation3 + $0x18] sm:$0xff] }
  0x13   : > { %v621_v5 = vld [vmem:[#allocation3 + $0x10] sm:$0xff]  ;;  %s844_s22 = smov (!%p246_p6, %s789_s22), 1  ;;  %v620_v6 = vld [vmem:[#allocation3 + $0x8] sm:$0xff]  ;;  %v619_v7 = vld [vmem:[#allocation3] sm:$0xff] }
  0x14   : > { %s550_s8 = sshll.u32 %s844_s22, 2  ;;  %v634_v9 = vld [vmem:[#allocation5 + $0x38] sm:$0xff]  ;;  %v633_v10 = vld [vmem:[#allocation5 + $0x30] sm:$0xff]  ;;  %v666_v11 = vld [vmem:[%s838_s2] ss:$0 sm:$0xff]  ;;  %s551_s14 = sshll.u32 %s844_s22, 3 }
  0x15   : > { %s249_s11 = scalar_lea.vmem %s836_s0, %s550_s8  ;;  %445 = vmatpush.bf16.msra.mxu1 %v634_v9  ;;  %v632_v12 = vld [vmem:[#allocation5 + $0x28] sm:$0xff]  ;;  %v631_v15 = vld [vmem:[#allocation5 + $0x20] sm:$0xff]  ;;  %v630_v18 = vld [vmem:[#allocation5 + $0x18] sm:$0xff]  ;;  %s253_s20 = scalar_lea.vmem %s841_s5, %s551_s14 }
  0x16   : > { %324 = vmatpush.bf16.msra.mxu0 %v625_v1  ;;  %v254_v8 = vld [vmem:[%s249_s11] sm:$0xf]  ;;  %v629_v22 = vld [vmem:[#allocation5 + $0x10] sm:$0xff]  ;;  %v628_v27 = vld [vmem:[#allocation5 + $0x8] sm:$0xff] }
  0x17   : > { %v627_v31 = vld [vmem:[#allocation5] sm:$0xff] }
  0x18   : > { %v667_v61 = vld [vmem:[%s840_s4] ss:$0 sm:$0xff] }
  0x19   : > { %446 = vmatpush.bf16.msra.mxu1 %v633_v10 }
  0x1a   : > { %325 = vmatpush.bf16.msra.mxu0 %v624_v2 }
  0x1d   : > { %447 = vmatpush.bf16.msra.mxu1 %v632_v12 }
  0x1e   : > { %326 = vmatpush.bf16.msra.mxu0 %v623_v3 }
  0x21   : > { %448 = vmatpush.bf16.msra.mxu1 %v631_v15 }
  0x22   : > { %327 = vmatpush.bf16.msra.mxu0 %v622_v4 }
  0x25   : > { %449 = vmatpush.bf16.msra.mxu1 %v630_v18 }
  0x26   : > { %328 = vmatpush.bf16.msra.mxu0 %v621_v5 }
  0x29   : > { %450 = vmatpush.bf16.msra.mxu1 %v629_v22 }
  0x2a   : > { %329 = vmatpush.bf16.msra.mxu0 %v620_v6 }
  0x2d   : > { %451 = vmatpush.bf16.msra.mxu1 %v628_v27 }
  0x2e   : > { %330 = vmatpush.bf16.msra.mxu0 %v619_v7 }
  0x31   : > { %331 = vmatmul.bf16.vlgmr.msra.gmra.mxu0 %v254_v8  ;;  %452 = vmatpush.bf16.msra.mxu1 %v627_v31 }
  0xae   : > { %v332_v13 = vpop.f32.mrf.mxu0 }
  0xaf   : > { %v333_v14 = vadd.f32 %v666_v11, %v332_v13 }
  0xb1   : > { %v337_v16 = vmul.f32 0.70710677, %v333_v14  ;;  %v336_v57 = vmul.f32 0.5, %v333_v14 }
  0xb3   : > { %v338_v17 = vmul.f32 %v337_v16, %v337_v16 }
  0xb5   : > { %v339_v19 = vmin.f32 %v338_v17, 16.0 }
  0xb6   : > { %v334_v20 = vpop.f32.mrf.mxu0 }
  0xb7   : > { %v340_v21 = vmul.f32 2.1237322e-06, %v339_v19  ;;  %v351_v23 = vmul.f32 3.8918573e-05, %v339_v19 }
  0xb9   : > { %v341_v24 = vadd.f32 0.00028619796, %v340_v21  ;;  %v352_v25 = vadd.f32 0.001143296, %v351_v23 }
  0xbb   : > { %v342_v26 = vmul.f32 %v341_v24, %v339_v19  ;;  %v353_v28 = vmul.f32 %v352_v25, %v339_v19 }
  0xbd   : > { %v354_v29 = vadd.f32 0.014752088, %v353_v28  ;;  %v343_v30 = vadd.f32 0.0036580483, %v342_v26 }
  0xbf   : > { %v355_v32 = vmul.f32 %v354_v29, %v339_v19  ;;  %v344_v34 = vmul.f32 %v343_v30, %v339_v19 }
  0xc1   : > { %v356_v33 = vadd.f32 0.112945676, %v355_v32  ;;  %v345_v37 = vadd.f32 0.05243302, %v344_v34 }
  0xc3   : > { %v357_v35 = vmul.f32 %v356_v33, %v339_v19  ;;  %v346_v40 = vmul.f32 %v345_v37, %v339_v19 }
  0xc5   : > { %v358_v36 = vadd.f32 0.4994258, %v357_v35  ;;  %v347_v41 = vadd.f32 0.18741608, %v346_v40 }
  0xc7   : > { %v359_v38 = vmul.f32 %v358_v36, %v339_v19  ;;  %v348_v43 = vmul.f32 %v347_v41, %v339_v19 }
  0xc9   : > { %v360_v39 = vadd.f32 1.0, %v359_v38  ;;  %v349_v47 = vadd.f32 1.1283791, %v348_v43 }
  0xcb   : > { %668 = vrcp.f32 %v360_v39  ;;  %v372_v46 = vand.u32 2147483648, %v360_v39  ;;  %v370_v49 = vand.u32 2147483647, %v360_v39  ;;  %vm366_vm1 = vweird.f32 %v360_v39 }
  0xcc   : > { %v350_v52 = vmul.f32 %v349_v47, %v337_v16 }
  0xcd   : > { %v373_v51 = vor.u32 1.1754944e-38, %v372_v46  ;;  %vm371_vm3 = vcmp.eq.f32.partialorder %v370_v49, 8.507059e+37 }
  0xd1   : > { %v669_v42 = vpop.eup %668 }
  0xd2   : > { %v362_v44 = vmul.f32 %v669_v42, %v360_v39  ;;  %vm367_vm0 = vweird.f32 %v669_v42 }
  0xd3   : > { %vm368_vm2 = vmor %vm366_vm1, %vm367_vm0 }
  0xd4   : > { %v363_v45 = vsub.f32 1.0, %v362_v44 }
  0xd6   : > { %v364_v48 = vmul.f32 %v669_v42, %v363_v45 }
  0xd8   : > { %v365_v50 = vadd.f32 %v669_v42, %v364_v48 }
  0xda   : > { %v369_v53 = vsel %vm368_vm2, %v669_v42, %v365_v50 }
  0xdb   : > { %v374_v54 = vsel %vm371_vm3, %v373_v51, %v369_v53 }
  0xdc   : > { %v375_v55 = vmul.f32 %v374_v54, %v350_v52 }
  0xde   : > { %v584_v56 = vclamps-f32 %v375_v55, 1.0 }
  0xe0   : > { %v378_v58 = vadd.f32 1.0, %v584_v56 }
  0xe2   : > { %v379_v59 = vmul.f32 %v378_v58, %v336_v57 }
  0xe4   : > { %v380_v60 = vpack.c.bf16 %v379_v59, %v379_v59 }
  0xe6   : > { %453 = vmatmul.bf16.vlgmr.msra.gmra.mxu1 %v380_v60 }
 0x163   : > { %v454_v62 = vpop.f32.mrf.mxu1 }
 0x164   : > { %v464_v63 = vadd.f32 %v667_v61, %v454_v62 }
 0x166   : > { %465 = vst [vmem:[%s253_s20] sm:$0xff] %v464_v63 }
 0x16b   : > { %v456_v0 = vpop.f32.mrf.mxu1 }
 0x16c PF: > { %s17_s18 = sadd.s32 1, %s744_s18  }
 0x16d   : > { %p14_p7 = scmp.ge.s32.totalorder %s17_s18, 4  }
 0x16f   :  { %16 = sbr.rel (!%p14_p7) target bundleno = 2 (0x2), region = 79 }
 0x174   :  { %485 = vsyncpa [#allocation4], 1 }
 0x175   :  { %487 = vsyncpa [#allocation4 + $0x1], 1 }
 0x176   :  { %488 = vsyncpa [#allocation6], 1 }

</bundles_post_ra>
